<compile_context>
chip_gen: v5e
topology: v5e:2x2
jax: 0.10.0
libtpu: 0.0.40
codegen_flags: <defaults>
</compile_context>

<pallas_src>
import functools
import math

import jax
import jax.numpy as jnp
from jax.experimental import pallas as pl
from jax.experimental.pallas import tpu as pltpu


# ---------------------------------------------------------------------------
# Kernels
# ---------------------------------------------------------------------------

def _pma_attn_kernel(q0_ref, mask_ref, x_ref, wlg_ref, blg_ref, wv_ref, bv_ref,
                     o_ref, *, num_heads, num_seeds, dim, tb, n):
    f32 = jnp.float32
    hs = num_heads * num_seeds

    x2 = x_ref[...].reshape(tb * n, dim)                 # (TB*N, dim), MXU dtype from HBM
    mxu = x2.dtype

    # All attention logits in ONE matmul: rows = TB*N; weight = Wk^T @ blockdiag(Q) * scale.
    logits = jnp.dot(x2, wlg_ref[...], preferred_element_type=f32) + blg_ref[...]   # (TB*N, H*S)

    # Value projection, rows = TB*N, kept lane-major (no head-major relayout).
    v = jnp.dot(x2, wv_ref[...], preferred_element_type=f32) + bv_ref[...]          # (TB*N, dim)

    # Softmax over keys.  Only the small (N, H*S) logits tile is transposed so the
    # reduction axis is the lane axis and the context matmul below is canonical.
    lt = jnp.transpose(logits.reshape(tb, n, hs), (0, 2, 1))                         # (TB, H*S, N)
    m = jnp.max(lt, axis=-1, keepdims=True)
    p = jnp.exp(lt - m)
    a = p * pl.reciprocal(jnp.sum(p, axis=-1, keepdims=True), approx=True)           # (TB, H*S, N)

    # One batched matmul for the context: all H*S attention rows pushed together against
    # untouched lane-major V.  full[b, h*S+s, :] = head-h attention applied to every value
    # column; the matching per-head (diagonal) blocks are selected below with a lane mask.
    v3 = v.reshape(tb, n, dim)
    full = jnp.einsum('bqn,bnd->bqd', a.astype(mxu), v3.astype(mxu),
                      preferred_element_type=f32)                                     # (TB, H*S, dim)

    mask = mask_ref[...]                                                              # (H, dim) f32
    ctx = full[:, 0:num_seeds, :] * mask[0][None, None, :]
    for h in range(1, num_heads):
        ctx = ctx + full[:, h * num_seeds:(h + 1) * num_seeds, :] * mask[h][None, None, :]

    # Residual with the hoisted, batch-invariant Q projection (heads concatenated on lanes).
    o_ref[...] = (q0_ref[...][None, :, :] + ctx).astype(o_ref.dtype)


def _pma_fco_kernel(o_ref, wo_ref, bo_ref, out_ref, *, tbo, num_seeds, dim):
    # Epilogue: O = O + relu(O @ Wo^T + bo), batched over all pooled rows.
    f32 = jnp.float32
    o = o_ref[...].reshape(tbo * num_seeds, dim)
    y = jnp.dot(o.astype(wo_ref.dtype), wo_ref[...], preferred_element_type=f32) + bo_ref[...]
    out_ref[...] = (o + jnp.maximum(y, 0.0)).reshape(tbo, num_seeds, dim).astype(out_ref.dtype)


# ---------------------------------------------------------------------------
# Wrapper
# ---------------------------------------------------------------------------

def _choose_tb(B, seq, dim, itemsize, max_tile_bytes):
    """Largest batch fold that fits the tile budget, preferring >= 2 grid steps."""
    divisors = [d for d in range(1, B + 1) if B % d == 0]
    fits = [d for d in divisors if d * seq * dim * itemsize <= max_tile_bytes]
    if not fits:
        return 1
    multi = [d for d in fits if B // d >= 2]      # keep both TCs busy on v7x / megacore
    return max(multi) if multi else max(fits)


def _const_spec(shape):
    """Grid-invariant operand: constant index_map + single VMEM buffer (no double-buffering)."""
    zero = (0,) * len(shape)
    return pl.BlockSpec(shape, lambda *_: zero, pipeline_mode=pl.Buffered(1))


def pma_forward(X, params, num_heads, *, mxu_dtype=jnp.float32, max_tile_bytes=4 << 20):
    """Pallas PMA forward. X: (B, N, dim) -> (B, num_seeds, dim) float32."""
    B, N, dim = X.shape
    f32 = jnp.float32
    S_seed = params["S"]                                    # (num_seeds, dim)
    num_seeds = S_seed.shape[0]
    assert dim % num_heads == 0, "dim must be divisible by num_heads"
    ds = dim // num_heads
    hs = num_heads * num_seeds

    # ---- hoisted, batch-invariant Q projection (heads concatenated on lanes).
    q0 = S_seed.astype(f32) @ params["wq"].T.astype(f32) + params["bq"].astype(f32)   # (S, dim)

    # ---- block-diagonal Q operand: qbd[h*ds+d, h*S+s] = q0[s, h*ds+d].
    qh = q0.reshape(num_seeds, num_heads, ds)                                          # [s, h, d]
    qbd = jnp.einsum('shd,hk->hdks', qh, jnp.eye(num_heads, dtype=f32)).reshape(dim, hs)

    # fc_k and the 1/sqrt(dim) scale folded into the logits operand (mathematically exact).
    scale = 1.0 / math.sqrt(dim)
    wlg = (params["wk"].T.astype(f32) @ qbd) * scale                                   # (dim, H*S)
    blg = ((params["bk"].astype(f32) @ qbd) * scale).reshape(1, hs)                    # (1, H*S)

    # PyTorch Linear stores W as (out, in); pre-transpose for x @ W.  MXU operands may be
    # bf16 (recommended on v5e/v6e/v7x); biases & accumulation stay f32.
    wlg_c = wlg.astype(mxu_dtype)
    wv_t = params["wv"].T.astype(mxu_dtype)
    wo_t = params["wo"].T.astype(mxu_dtype)
    bv = params["bv"].reshape(1, dim).astype(f32)
    bo = params["bo"].reshape(1, dim).astype(f32)

    # Static per-head lane mask for the diagonal-block select: mask[h, c] = (c // ds == h).
    headmask = (jnp.arange(dim)[None, :] // ds == jnp.arange(num_heads)[:, None]).astype(f32)

    # X cast in the wrapper so the dominant HBM->VMEM stream / double buffer is already
    # in the MXU dtype (no in-kernel full-slab cast).
    Xc = X.astype(mxu_dtype)
    itemsize = jnp.dtype(mxu_dtype).itemsize

    tb = _choose_tb(B, N, dim, itemsize, max_tile_bytes)
    n_blocks = B // tb

    # VMEM footprint estimate; only raise the scoped limit when the smallest default (16 MiB
    # on v5e) would not suffice.  Capped at 64 MiB so it stays valid on v7x.
    x_tile = tb * N * dim * itemsize
    f32_tile = tb * N * dim * 4
    est = 2 * x_tile + 4 * f32_tile + 2 * dim * dim * itemsize + (4 << 20)
    vmem_limit = None if est <= (16 << 20) else int(min(est, 64 << 20))

    attn_kernel = functools.partial(
        _pma_attn_kernel, num_heads=num_heads, num_seeds=num_seeds, dim=dim, tb=tb, n=N)

    o_pre = pl.pallas_call(
        attn_kernel,
        out_shape=jax.ShapeDtypeStruct((B, num_seeds, dim), f32),
        grid_spec=pltpu.PrefetchScalarGridSpec(
            num_scalar_prefetch=0,
            grid=(n_blocks,),
            in_specs=[
                _const_spec((num_seeds, dim)),                      # q0 (residual)
                _const_spec((num_heads, dim)),                      # head lane mask
                pl.BlockSpec((tb, N, dim), lambda b: (b, 0, 0)),    # X slab
                _const_spec((dim, hs)), _const_spec((1, hs)),       # folded logits weight/bias
                _const_spec((dim, dim)), _const_spec((1, dim)),     # fc_v
            ],
            out_specs=pl.BlockSpec((tb, num_seeds, dim), lambda b: (b, 0, 0)),
        ),
        compiler_params=pltpu.CompilerParams(
            dimension_semantics=("parallel",), vmem_limit_bytes=vmem_limit),
    )(q0, headmask, Xc, wlg_c, blg, wv_t, bv)

    # ---- hoisted epilogue: O = O + relu(fc_o(O)) over the pooled (B*num_seeds, dim) rows.
    tbo = _choose_tb(B, num_seeds, dim, 4, max_tile_bytes)
    fco_kernel = functools.partial(_pma_fco_kernel, tbo=tbo, num_seeds=num_seeds, dim=dim)

    out = pl.pallas_call(
        fco_kernel,
        out_shape=jax.ShapeDtypeStruct((B, num_seeds, dim), f32),
        grid_spec=pltpu.PrefetchScalarGridSpec(
            num_scalar_prefetch=0,
            grid=(B // tbo,),
            in_specs=[
                pl.BlockSpec((tbo, num_seeds, dim), lambda b: (b, 0, 0)),
                _const_spec((dim, dim)), _const_spec((1, dim)),
            ],
            out_specs=pl.BlockSpec((tbo, num_seeds, dim), lambda b: (b, 0, 0)),
        ),
        compiler_params=pltpu.CompilerParams(dimension_semantics=("parallel",)),
    )(o_pre, wo_t, bo)

    return out


# ---------------------------------------------------------------------------
# Reference + demo
# ---------------------------------------------------------------------------

def pma_reference(X, params, num_heads):
    """Pure-JAX reference replicating the PyTorch PMA/MAB semantics."""
    B, N, dim = X.shape
    S_seed = params["S"]
    num_seeds = S_seed.shape[0]
    Z = jnp.broadcast_to(S_seed[None], (B, num_seeds, dim))

    Q = Z @ params["wq"].T + params["bq"]
    K = X @ params["wk"].T + params["bk"]
    V = X @ params["wv"].T + params["bv"]

    ds = dim // num_heads
    Q_ = jnp.concatenate([Q[:, :, h * ds:(h + 1) * ds] for h in range(num_heads)], 0)
    K_ = jnp.concatenate([K[:, :, h * ds:(h + 1) * ds] for h in range(num_heads)], 0)
    V_ = jnp.concatenate([V[:, :, h * ds:(h + 1) * ds] for h in range(num_heads)], 0)

    A = jax.nn.softmax(jnp.einsum("bqd,bkd->bqk", Q_, K_) / math.sqrt(dim), axis=2)
    O_ = Q_ + jnp.einsum("bqk,bkd->bqd", A, V_)
    O = jnp.concatenate([O_[h * B:(h + 1) * B] for h in range(num_heads)], 2)
    O = O + jax.nn.relu(O @ params["wo"].T + params["bo"])
    return O


def init_params(key, dim, num_seeds):
    ks = jax.random.split(key, 9)
    a_s = math.sqrt(6.0 / (num_seeds * dim + dim))   # xavier-uniform-ish for the seeds
    a_w = math.sqrt(6.0 / (dim + dim))
    b_b = 1.0 / math.sqrt(dim)
    u = lambda k, shape, a: jax.random.uniform(k, shape, jnp.float32, -a, a)
    return {
        "S": u(ks[0], (num_seeds, dim), a_s),
        "wq": u(ks[1], (dim, dim), a_w), "bq": u(ks[2], (dim,), b_b),
        "wk": u(ks[3], (dim, dim), a_w), "bk": u(ks[4], (dim,), b_b),
        "wv": u(ks[5], (dim, dim), a_w), "bv": u(ks[6], (dim,), b_b),
        "wo": u(ks[7], (dim, dim), a_w), "bo": u(ks[8], (dim,), b_b),
    }


if __name__ == "__main__":
    B, N, dim = 2, 8, 32
    num_heads, num_seeds = 4, 4

    key = jax.random.PRNGKey(0)
    kp, kx = jax.random.split(key)
    params = init_params(kp, dim, num_seeds)
    X = jax.random.normal(kx, (B, N, dim), jnp.float32)

    ref = pma_reference(X, params, num_heads)

    # f32 MXU path (default): near-exact vs the f32 reference (approx softmax reciprocal only).
    fwd_f32 = jax.jit(functools.partial(pma_forward, num_heads=num_heads))
    out = jax.block_until_ready(fwd_f32(X, params))
    assert out.shape == (B, num_seeds, dim)
    assert jnp.allclose(out, ref, atol=5e-3, rtol=5e-3), "f32 kernel mismatch vs reference"

    # bf16 MXU path (recommended on v5e/v6e/v7x): bf16 operands, f32 accumulate / softmax / residual.
    fwd_bf16 = jax.jit(functools.partial(pma_forward, num_heads=num_heads,
                                         mxu_dtype=jnp.bfloat16))
    out_bf16 = jax.block_until_ready(fwd_bf16(X, params))
    assert out_bf16.shape == (B, num_seeds, dim)
    assert jnp.all(jnp.isfinite(out_bf16))
    assert jnp.allclose(out_bf16, ref, atol=1e-1, rtol=1e-1), "bf16 kernel mismatch vs reference"

    print("KERNEL_OK")
</pallas_src>

<mosaic_0001>
module attributes {stable_mosaic.version = 11 : i64} {
  func.func @_pma_fco_kernel(%arg0: i32, %arg1: memref<1x4x32xf32, #tpu.memory_space<vmem>>, %arg2: memref<32x32xf32, #tpu.memory_space<vmem>>, %arg3: memref<1x32xf32, #tpu.memory_space<vmem>>, %arg4: memref<1x4x32xf32, #tpu.memory_space<vmem>>) attributes {dimension_semantics = [#tpu.dimension_semantics<parallel>], iteration_bounds = array<i64: 2>, scalar_prefetch = 0 : i64, scratch_operands = 0 : i64, tpu.core_type = #tpu.core_type<tc>, window_params = [{transform_indices = @transform_0, window_bounds = array<i64: 1, 4, 32>}, {pipeline_mode = #tpu.pipeline_mode<synchronous>, transform_indices = @transform_1, window_bounds = array<i64: 32, 32>}, {pipeline_mode = #tpu.pipeline_mode<synchronous>, transform_indices = @transform_2, window_bounds = array<i64: 1, 32>}, {transform_indices = @transform_3, window_bounds = array<i64: 1, 4, 32>}]} {
    %c0 = arith.constant 0 : index
    %c0_0 = arith.constant 0 : index
    %c0_1 = arith.constant 0 : index
    %0 = vector.load %arg1[%c0, %c0_0, %c0_1] : memref<1x4x32xf32, #tpu.memory_space<vmem>>, vector<1x4x32xf32>
    %1 = vector.shape_cast %0 : vector<1x4x32xf32> to vector<4x32xf32>
    %c0_2 = arith.constant 0 : index
    %c0_3 = arith.constant 0 : index
    %2 = vector.load %arg2[%c0_2, %c0_3] : memref<32x32xf32, #tpu.memory_space<vmem>>, vector<32x32xf32>
    %cst = arith.constant dense<0.000000e+00> : vector<4x32xf32>
    %3 = tpu.matmul %1, %2, %cst {dimension_numbers = #tpu.dot_dimension_numbers<[1], [0], [0], [1], [0, 0, 1, 1], [], []>} : vector<4x32xf32>, vector<32x32xf32>, vector<4x32xf32> -> vector<4x32xf32>
    %c0_4 = arith.constant 0 : index
    %c0_5 = arith.constant 0 : index
    %4 = vector.load %arg3[%c0_4, %c0_5] : memref<1x32xf32, #tpu.memory_space<vmem>>, vector<1x32xf32>
    %5 = vector.broadcast %4 : vector<1x32xf32> to vector<4x32xf32>
    %6 = arith.addf %3, %5 : vector<4x32xf32>
    %cst_6 = arith.constant 0.000000e+00 : f32
    %7 = vector.broadcast %cst_6 : f32 to vector<4x32xf32>
    %8 = arith.maximumf %6, %7 : vector<4x32xf32>
    %9 = arith.addf %1, %8 : vector<4x32xf32>
    %10 = vector.shape_cast %9 : vector<4x32xf32> to vector<1x4x32xf32>
    %c0_7 = arith.constant 0 : index
    %c0_8 = arith.constant 0 : index
    %c0_9 = arith.constant 0 : index
    %11 = vector.load %arg4[%c0_7, %c0_8, %c0_9] : memref<1x4x32xf32, #tpu.memory_space<vmem>>, vector<1x4x32xf32>
    tpu.vector_store %arg4[%c0_7, %c0_8, %c0_9], %10 {strides = array<i32>} : memref<1x4x32xf32, #tpu.memory_space<vmem>>, vector<1x4x32xf32>,
    return
  }
  func.func @transform_0(%arg0: i32) -> (i32, i32, i32) {
    %c0_i32 = arith.constant 0 : i32
    %c0_i32_0 = arith.constant 0 : i32
    %c0_i32_1 = arith.constant 0 : i32
    return %arg0, %c0_i32, %c0_i32_0 : i32, i32, i32
  }
  func.func @transform_1(%arg0: i32) -> (i32, i32) {
    %c0_i32 = arith.constant 0 : i32
    %c0_i32_0 = arith.constant 0 : i32
    %c0_i32_1 = arith.constant 0 : i32
    return %c0_i32, %c0_i32_0 : i32, i32
  }
  func.func @transform_2(%arg0: i32) -> (i32, i32) {
    %c0_i32 = arith.constant 0 : i32
    %c0_i32_0 = arith.constant 0 : i32
    %c0_i32_1 = arith.constant 0 : i32
    return %c0_i32, %c0_i32_0 : i32, i32
  }
  func.func @transform_3(%arg0: i32) -> (i32, i32, i32) {
    %c0_i32 = arith.constant 0 : i32
    %c0_i32_0 = arith.constant 0 : i32
    %c0_i32_1 = arith.constant 0 : i32
    return %arg0, %c0_i32, %c0_i32_0 : i32, i32, i32
  }
}

module attributes {stable_mosaic.version = 11 : i64} {
  func.func @_pma_attn_kernel(%arg0: i32, %arg1: memref<4x32xf32, #tpu.memory_space<vmem>>, %arg2: memref<4x32xf32, #tpu.memory_space<vmem>>, %arg3: memref<1x8x32xf32, #tpu.memory_space<vmem>>, %arg4: memref<32x16xf32, #tpu.memory_space<vmem>>, %arg5: memref<1x16xf32, #tpu.memory_space<vmem>>, %arg6: memref<32x32xf32, #tpu.memory_space<vmem>>, %arg7: memref<1x32xf32, #tpu.memory_space<vmem>>, %arg8: memref<1x4x32xf32, #tpu.memory_space<vmem>>) attributes {dimension_semantics = [#tpu.dimension_semantics<parallel>], iteration_bounds = array<i64: 2>, scalar_prefetch = 0 : i64, scratch_operands = 0 : i64, tpu.core_type = #tpu.core_type<tc>, window_params = [{pipeline_mode = #tpu.pipeline_mode<synchronous>, transform_indices = @transform_0, window_bounds = array<i64: 4, 32>}, {pipeline_mode = #tpu.pipeline_mode<synchronous>, transform_indices = @transform_1, window_bounds = array<i64: 4, 32>}, {transform_indices = @transform_2, window_bounds = array<i64: 1, 8, 32>}, {pipeline_mode = #tpu.pipeline_mode<synchronous>, transform_indices = @transform_3, window_bounds = array<i64: 32, 16>}, {pipeline_mode = #tpu.pipeline_mode<synchronous>, transform_indices = @transform_4, window_bounds = array<i64: 1, 16>}, {pipeline_mode = #tpu.pipeline_mode<synchronous>, transform_indices = @transform_5, window_bounds = array<i64: 32, 32>}, {pipeline_mode = #tpu.pipeline_mode<synchronous>, transform_indices = @transform_6, window_bounds = array<i64: 1, 32>}, {transform_indices = @transform_7, window_bounds = array<i64: 1, 4, 32>}]} {
    %c0 = arith.constant 0 : index
    %c0_0 = arith.constant 0 : index
    %c0_1 = arith.constant 0 : index
    %0 = vector.load %arg3[%c0, %c0_0, %c0_1] : memref<1x8x32xf32, #tpu.memory_space<vmem>>, vector<1x8x32xf32>
    %1 = vector.shape_cast %0 : vector<1x8x32xf32> to vector<8x32xf32>
    %c0_2 = arith.constant 0 : index
    %c0_3 = arith.constant 0 : index
    %2 = vector.load %arg4[%c0_2, %c0_3] : memref<32x16xf32, #tpu.memory_space<vmem>>, vector<32x16xf32>
    %cst = arith.constant dense<0.000000e+00> : vector<8x16xf32>
    %3 = tpu.matmul %1, %2, %cst {dimension_numbers = #tpu.dot_dimension_numbers<[1], [0], [0], [1], [0, 0, 1, 1], [], []>} : vector<8x32xf32>, vector<32x16xf32>, vector<8x16xf32> -> vector<8x16xf32>
    %c0_4 = arith.constant 0 : index
    %c0_5 = arith.constant 0 : index
    %4 = vector.load %arg5[%c0_4, %c0_5] : memref<1x16xf32, #tpu.memory_space<vmem>>, vector<1x16xf32>
    %5 = vector.broadcast %4 : vector<1x16xf32> to vector<8x16xf32>
    %6 = arith.addf %3, %5 : vector<8x16xf32>
    %c0_6 = arith.constant 0 : index
    %c0_7 = arith.constant 0 : index
    %7 = vector.load %arg6[%c0_6, %c0_7] : memref<32x32xf32, #tpu.memory_space<vmem>>, vector<32x32xf32>
    %cst_8 = arith.constant dense<0.000000e+00> : vector<8x32xf32>
    %8 = tpu.matmul %1, %7, %cst_8 {dimension_numbers = #tpu.dot_dimension_numbers<[1], [0], [0], [1], [0, 0, 1, 1], [], []>} : vector<8x32xf32>, vector<32x32xf32>, vector<8x32xf32> -> vector<8x32xf32>
    %c0_9 = arith.constant 0 : index
    %c0_10 = arith.constant 0 : index
    %9 = vector.load %arg7[%c0_9, %c0_10] : memref<1x32xf32, #tpu.memory_space<vmem>>, vector<1x32xf32>
    %10 = vector.broadcast %9 : vector<1x32xf32> to vector<8x32xf32>
    %11 = arith.addf %8, %10 : vector<8x32xf32>
    %12 = vector.shape_cast %6 : vector<8x16xf32> to vector<1x8x16xf32>
    %13 = tpu.transpose %12, [0, 2, 1] : vector<1x8x16xf32> -> vector<1x16x8xf32>
    %cst_11 = arith.constant dense<0xFF800000> : vector<1x16xf32>
    %14 = vector.multi_reduction <maximumf>, %13, %cst_11 [2] : vector<1x16x8xf32> to vector<1x16xf32>
    %15 = vector.shape_cast %14 : vector<1x16xf32> to vector<1x16x1xf32>
    %16 = vector.broadcast %15 : vector<1x16x1xf32> to vector<1x16x8xf32>
    %17 = arith.subf %13, %16 : vector<1x16x8xf32>
    %18 = math.exp %17 : vector<1x16x8xf32>
    %cst_12 = arith.constant dense<0.000000e+00> : vector<1x16xf32>
    %19 = vector.multi_reduction <add>, %18, %cst_12 [2] : vector<1x16x8xf32> to vector<1x16xf32>
    %20 = vector.shape_cast %19 : vector<1x16xf32> to vector<1x16x1xf32>
    %21 = tpu.reciprocal %20 {approx = true} : vector<1x16x1xf32> -> vector<1x16x1xf32>
    %22 = vector.broadcast %21 : vector<1x16x1xf32> to vector<1x16x8xf32>
    %23 = arith.mulf %18, %22 : vector<1x16x8xf32>
    %24 = vector.shape_cast %11 : vector<8x32xf32> to vector<1x8x32xf32>
    "tpu.trace_start"() <{level = 10 : i32, message = "bqn,bnd->bqd"}> : () -> ()
    %cst_13 = arith.constant dense<0.000000e+00> : vector<1x16x32xf32>
    %25 = tpu.matmul %23, %24, %cst_13 {dimension_numbers = #tpu.dot_dimension_numbers<[2], [1], [1], [2], [0, 0, 0, 1, 1, 2], [0], [0]>} : vector<1x16x8xf32>, vector<1x8x32xf32>, vector<1x16x32xf32> -> vector<1x16x32xf32>
    "tpu.trace_stop"() : () -> ()
    %c0_14 = arith.constant 0 : index
    %c0_15 = arith.constant 0 : index
    %26 = vector.load %arg2[%c0_14, %c0_15] : memref<4x32xf32, #tpu.memory_space<vmem>>, vector<4x32xf32>
    %27 = vector.extract_strided_slice %25 {offsets = [0, 0, 0], sizes = [1, 4, 32], strides = [1, 1, 1]} : vector<1x16x32xf32> to vector<1x4x32xf32>
    %28 = vector.extract_strided_slice %26 {offsets = [0, 0], sizes = [1, 32], strides = [1, 1]} : vector<4x32xf32> to vector<1x32xf32>
    %29 = vector.shape_cast %28 : vector<1x32xf32> to vector<32xf32>
    %30 = vector.shape_cast %29 : vector<32xf32> to vector<1x1x32xf32>
    %31 = vector.broadcast %30 : vector<1x1x32xf32> to vector<1x4x32xf32>
    %32 = arith.mulf %27, %31 : vector<1x4x32xf32>
    %33 = vector.extract_strided_slice %25 {offsets = [0, 4, 0], sizes = [1, 4, 32], strides = [1, 1, 1]} : vector<1x16x32xf32> to vector<1x4x32xf32>
    %34 = vector.extract_strided_slice %26 {offsets = [1, 0], sizes = [1, 32], strides = [1, 1]} : vector<4x32xf32> to vector<1x32xf32>
    %35 = vector.shape_cast %34 : vector<1x32xf32> to vector<32xf32>
    %36 = vector.shape_cast %35 : vector<32xf32> to vector<1x1x32xf32>
    %37 = vector.broadcast %36 : vector<1x1x32xf32> to vector<1x4x32xf32>
    %38 = arith.mulf %33, %37 : vector<1x4x32xf32>
    %39 = arith.addf %32, %38 : vector<1x4x32xf32>
    %40 = vector.extract_strided_slice %25 {offsets = [0, 8, 0], sizes = [1, 4, 32], strides = [1, 1, 1]} : vector<1x16x32xf32> to vector<1x4x32xf32>
    %41 = vector.extract_strided_slice %26 {offsets = [2, 0], sizes = [1, 32], strides = [1, 1]} : vector<4x32xf32> to vector<1x32xf32>
    %42 = vector.shape_cast %41 : vector<1x32xf32> to vector<32xf32>
    %43 = vector.shape_cast %42 : vector<32xf32> to vector<1x1x32xf32>
    %44 = vector.broadcast %43 : vector<1x1x32xf32> to vector<1x4x32xf32>
    %45 = arith.mulf %40, %44 : vector<1x4x32xf32>
    %46 = arith.addf %39, %45 : vector<1x4x32xf32>
    %47 = vector.extract_strided_slice %25 {offsets = [0, 12, 0], sizes = [1, 4, 32], strides = [1, 1, 1]} : vector<1x16x32xf32> to vector<1x4x32xf32>
    %48 = vector.extract_strided_slice %26 {offsets = [3, 0], sizes = [1, 32], strides = [1, 1]} : vector<4x32xf32> to vector<1x32xf32>
    %49 = vector.shape_cast %48 : vector<1x32xf32> to vector<32xf32>
    %50 = vector.shape_cast %49 : vector<32xf32> to vector<1x1x32xf32>
    %51 = vector.broadcast %50 : vector<1x1x32xf32> to vector<1x4x32xf32>
    %52 = arith.mulf %47, %51 : vector<1x4x32xf32>
    %53 = arith.addf %46, %52 : vector<1x4x32xf32>
    %c0_16 = arith.constant 0 : index
    %c0_17 = arith.constant 0 : index
    %54 = vector.load %arg1[%c0_16, %c0_17] : memref<4x32xf32, #tpu.memory_space<vmem>>, vector<4x32xf32>
    %55 = vector.shape_cast %54 : vector<4x32xf32> to vector<1x4x32xf32>
    %56 = arith.addf %55, %53 : vector<1x4x32xf32>
    %c0_18 = arith.constant 0 : index
    %c0_19 = arith.constant 0 : index
    %c0_20 = arith.constant 0 : index
    %57 = vector.load %arg8[%c0_18, %c0_19, %c0_20] : memref<1x4x32xf32, #tpu.memory_space<vmem>>, vector<1x4x32xf32>
    tpu.vector_store %arg8[%c0_18, %c0_19, %c0_20], %56 {strides = array<i32>} : memref<1x4x32xf32, #tpu.memory_space<vmem>>, vector<1x4x32xf32>,
    return
  }
  func.func @transform_0(%arg0: i32) -> (i32, i32) {
    %c0_i32 = arith.constant 0 : i32
    %c0_i32_0 = arith.constant 0 : i32
    %c0_i32_1 = arith.constant 0 : i32
    return %c0_i32, %c0_i32_0 : i32, i32
  }
  func.func @transform_1(%arg0: i32) -> (i32, i32) {
    %c0_i32 = arith.constant 0 : i32
    %c0_i32_0 = arith.constant 0 : i32
    %c0_i32_1 = arith.constant 0 : i32
    return %c0_i32, %c0_i32_0 : i32, i32
  }
  func.func @transform_2(%arg0: i32) -> (i32, i32, i32) {
    %c0_i32 = arith.constant 0 : i32
    %c0_i32_0 = arith.constant 0 : i32
    %c0_i32_1 = arith.constant 0 : i32
    return %arg0, %c0_i32, %c0_i32_0 : i32, i32, i32
  }
  func.func @transform_3(%arg0: i32) -> (i32, i32) {
    %c0_i32 = arith.constant 0 : i32
    %c0_i32_0 = arith.constant 0 : i32
    %c0_i32_1 = arith.constant 0 : i32
    return %c0_i32, %c0_i32_0 : i32, i32
  }
  func.func @transform_4(%arg0: i32) -> (i32, i32) {
    %c0_i32 = arith.constant 0 : i32
    %c0_i32_0 = arith.constant 0 : i32
    %c0_i32_1 = arith.constant 0 : i32
    return %c0_i32, %c0_i32_0 : i32, i32
  }
  func.func @transform_5(%arg0: i32) -> (i32, i32) {
    %c0_i32 = arith.constant 0 : i32
    %c0_i32_0 = arith.constant 0 : i32
    %c0_i32_1 = arith.constant 0 : i32
    return %c0_i32, %c0_i32_0 : i32, i32
  }
  func.func @transform_6(%arg0: i32) -> (i32, i32) {
    %c0_i32 = arith.constant 0 : i32
    %c0_i32_0 = arith.constant 0 : i32
    %c0_i32_1 = arith.constant 0 : i32
    return %c0_i32, %c0_i32_0 : i32, i32
  }
  func.func @transform_7(%arg0: i32) -> (i32, i32, i32) {
    %c0_i32 = arith.constant 0 : i32
    %c0_i32_0 = arith.constant 0 : i32
    %c0_i32_1 = arith.constant 0 : i32
    return %arg0, %c0_i32, %c0_i32_0 : i32, i32, i32
  }
}

</mosaic_0001>

<bundles_post_ra>
// kernel: pma_forward.3
= control target key start
LH: loop header
LB: loop body
LE: loop exit
PB: predicated region body
PF: predicated region fallthrough
CT: control target
= control target key end

     0   :  { %8 = vsyncpa [#allocation3], 0  ;;  %s513_s0 = inlined_call_operand.vmem [shape: f32[2,4,32], index: 0, kind: input, shape index: {}]   ;;  %s514_s1 = inlined_call_operand.vmem [shape: f32[32,32], index: 1, kind: input, shape index: {}]   ;;  %s515_s2 = inlined_call_operand.vmem [shape: f32[1,32], index: 2, kind: input, shape index: {}]   ;;  %s516_s3 = inlined_call_operand.hbm [shape: f32[2,4,32], index: 3, kind: output, shape index: {}]  }
   0x1   :  { %10 = vsyncpa [#allocation3 + $0x1], 0  ;;  %s413_s12 = smov 0   ;;  %s415_s13 = smov 0  }
   0x2   :  { %s417_s14 = smov 0   ;;  %s419_s15 = smov 0  }
   0x3 LB: > { %s434_s16 = sadd.s32 4294967295, %s391_s15   ;;  %s278_s17 = sadd.s32 4294967294, %s391_s15   ;;  %s391_s15 = sphi %s419_s15, %s522_s15   ;;  %s387_s14 = sphi %s417_s14, %s521_s14   ;;  %s383_s13 = sphi %s415_s13, %s520_s13   ;;  %s379_s12 = sphi %s413_s12, %s519_s12  }
   0x4   : > { %s438_s18 = sadd.s32 1, %s391_s15   ;;  %s91_s19 = sadd.s32 1, %s387_s14 }
   0x5   : > { %s88_s20 = ssub.s32 %s391_s15, %s438_s18  ;;  %p101_p0 = scmp.ne.s32.totalorder %s387_s14, %s383_s13 }
   0x6   : > { %p89_p1 = scmp.eq.s32.totalorder %s88_s20, 0  ;;  %p102_p2 = scmp.eq.s32.totalorder %s434_s16, 1 }
   0x7   : > { %p107_p3 = scmp.ne.s32.totalorder %s383_s13, %s379_s12  ;;  %p108_p4 = scmp.eq.s32.totalorder %s278_s17, 1 }
   0x8   : > { %s449_s21 = scalar_select %p89_p1, %s387_s14, %s91_s19  }
   0x9   : > { %p451_p5 = por %p102_p2, %p101_p0  ;;  %p455_p6 = por %p108_p4, %p107_p3 }
   0xa   : > { %p281_p7 = scmp.ge.s32.totalorder %s391_s15, 1  ;;  %p139_p8 = scmp.lt.s32.totalorder %s391_s15, 3 }
   0xc   : > { %p140_p9 = pnand %p281_p7, %p139_p8 }
   0xd   : > { %p162_p10 = scmp.lt.s32.totalorder (!%p140_p9), %s434_s16, 1  ;;  %s159_s10 = sand.u32 (!%p140_p9), 1, %s383_s13  }
   0xe   : > { %143 = sbr.rel (%p140_p9) target bundleno = 162 (0xa2), region = 32  ;;  %s282_s11 = sshll.u32 (!%p140_p9), %s159_s10, 2 }
   0xf   : > { %s286_s17 = sshll.u32 (!%p140_p9), %s434_s16, 2  ;;  %s161_s27 = scalar_lea.vmem (!%p140_p9), [#allocation2], %s282_s11 }
  0x10   : > { %s214_s26 = scalar_lea.hbm (!%p140_p9), %s516_s3, %s286_s17  ;;  %s216_s28 = sshll.u32 (!%p140_p9), %s161_s27, 4  ;;  %s217_s28 = int_to_ptr.vmem [resolvable:$true] %s216_s28 }
  0x11   : > { %s218_s29 = sshll.u32 (!%p140_p9), %s214_s26, 4  ;;  %s349_s7 = scalar_lea.hbm (!%p140_p9), %s516_s3, 8  ;;  %s219_s29 = int_to_ptr.hbm [resolvable:$true] %s218_s29 }
  0x13   : > { %v170_v0 = vld [vmem:[%s514_s1 + $0x18] sm:$0xff]  ;;  %v169_v1 = vld [vmem:[%s514_s1 + $0x10] sm:$0xff]  ;;  %v168_v2 = vld [vmem:[%s514_s1 + $0x8] sm:$0xff]  ;;  %s163_s30 = scalar_select %p162_p10, %s434_s16, 1  ;;  %vm175_vm0 = vcmask 261120   ;;  %vm201_vm1 = vcmask 257024  }
  0x14   : > { %191 = vmatpush.msra.mxu0 %v170_v0  ;;  %v167_v3 = vld [vmem:[%s514_s1] sm:$0xff]  ;;  %s204_s16 = scalar_lea.sflag [#allocation3], %s159_s10 }
  0x15   : > { %s283_s6 = sshll.u32 %s163_s30, 2  ;;  %v328_v5 = vld [vmem:[%s515_s2] ss:$0 sm:$0xff]  ;;  %s343_s30 = sshra.s32 %s219_s29, 4  ;;  %s344_s30 = int_to_ptr.hbm [resolvable:$true] %s343_s30 }
  0x16   : > { %192 = vmatpush.msra.mxu0 %v169_v1  ;;  %s165_s9 = scalar_lea.vmem %s513_s0, %s283_s6  ;;  %s345_s4 = scalar_lea.hbm %s344_s30, 4 }
  0x17   : > { %v166_v4 = vld [vmem:[%s165_s9] sm:$0xf]  ;;  %p346_p11 = scmp.ne.s32.totalorder %s344_s30, %s345_s4  ;;  %p350_p0 = scmp.lt.s32.totalorder %s344_s30, %s516_s3 }
  0x18   : > { %193 = vmatpush.msra.mxu0 %v168_v2  ;;  %p351_p1 = scmp.lt.s32.totalorder %s349_s7, %s345_s4 }
  0x19   : > { %p347_p12 = pnand %p346_p11, %p451_p5 }
  0x1a   : > { %194 = vmatpush.msra.mxu0 %v167_v3  ;;  %p352_p2 = por %p351_p1, %p350_p0 }
  0x1b   : > { %284 = vmatmul.msk.f32.vlgmr.msra.gmra.mxu0 %vm175_vm0, %v166_v4  ;;  %p348_p13 = pneg %p347_p12 }
  0x1d   : > { %p353_p3 = pnand %p352_p2, %p348_p13 }
  0x98   : > { %v196_v6 = vpop.f32.mrf.mxu0 }
  0x99   : > { %v197_v7 = vadd.f32 %v328_v5, %v196_v6 }
  0x9b   : > { %v199_v8 = vmax.f32 %v197_v7, 0.0 }
  0x9d   : > { %v200_v9 = vadd.f32 %v199_v8, %v166_v4 }
  0x9f   : > { %202 = vst.msk [vmem:[%s161_s27] sm:$0xf] %vm201_vm1, %v200_v9 }
  0xa0   : > { %356 = shalt.err (!%p353_p3)
}
  0xa1   : > { %289 = dma.vmem_to_hbm [thread:$0]  (%p451_p5), %s217_s28, 64, %s219_s29, %s204_s16  }
  0xa2 PF: > { %p295_p4 = scmp.ge.s32.totalorder %s391_s15, 2  ;;  %s230_s10 = sand.u32 1, %s379_s12  }
  0xa3   : > { %s231_s11 = scalar_lea.sflag [#allocation3], %s230_s10 }
  0xa4   : > { %p292_p7 = pnand %p295_p4, %p455_p6 }
  0xa6   : > { %p293_p8 = pneg %p292_p7 }
  0xa8   : > { %374 = dma.done.wait (%p293_p8), %s231_s11, 64  }
  0xa9   : > { %376 = vsyncadd (%p293_p8), %s231_s11, 4294967232  ;;  %p13_p9 = scmp.ge.s32.totalorder %s438_s18, 4   ;;  %s519_s12 = smov %s383_s13 }
  0xaa   : > { %s520_s13 = smov %s387_s14  ;;  %s521_s14 = smov %s449_s21 }
  0xab   : > { %s522_s15 = smov %s438_s18  ;;  %15 = sbr.rel (!%p13_p9) target bundleno = 3 (0x3), region = 67 }
  0xb0   :  { %237 = vsyncpa [#allocation3], 1 }
  0xb1   :  { %239 = vsyncpa [#allocation3 + $0x1], 1 }

// kernel: pma_forward.2
= control target key start
LH: loop header
LB: loop body
LE: loop exit
PB: predicated region body
PF: predicated region fallthrough
CT: control target
= control target key end

     0   :  { %s575_s24 = smov 0   ;;  %s640_s0 = inlined_call_operand.vmem [shape: f32[4,32], index: 0, kind: input, shape index: {}]   ;;  %s641_s1 = inlined_call_operand.vmem [shape: f32[4,32], index: 1, kind: input, shape index: {}]   ;;  %s642_s2 = inlined_call_operand.vmem [shape: f32[2,8,32], index: 2, kind: input, shape index: {}]   ;;  %s643_s3 = inlined_call_operand.vmem [shape: f32[32,16], index: 3, kind: input, shape index: {}]   ;;  %s644_s4 = inlined_call_operand.vmem [shape: f32[1,16], index: 4, kind: input, shape index: {}]   ;;  %s645_s5 = inlined_call_operand.vmem [shape: f32[32,32], index: 5, kind: input, shape index: {}]   ;;  %s646_s6 = inlined_call_operand.vmem [shape: f32[1,32], index: 6, kind: input, shape index: {}]   ;;  %s647_s7 = inlined_call_operand.vmem [shape: f32[2,4,32], index: 7, kind: output, shape index: {}]  }
   0x1 LB: > { %s494_s25 = sadd.s32 4294967295, %s533_s24   ;;  %p498_p0 = scmp.ge.s32.totalorder %s533_s24, 1  ;;  %s533_s24 = sphi %s575_s24, %s17_s24  }
   0x2   : > { %p236_p1 = scmp.lt.s32.totalorder %s533_s24, 3 }
   0x4   : > { %p237_p2 = pnand %p498_p0, %p236_p1 }
   0x5   : > { %p266_p3 = scmp.lt.s32.totalorder (!%p237_p2), %s494_s25, 1 }
   0x6   : > { %240 = sbr.rel (%p237_p2) target bundleno = 715 (0x2cb), region = 48 }
   0xb   : > { %v278_v0 = vld [vmem:[%s643_s3 + $0x18] sm:$0xff]  ;;  %v277_v1 = vld [vmem:[%s643_s3 + $0x10] sm:$0xff]  ;;  %v276_v2 = vld [vmem:[%s643_s3 + $0x8] sm:$0xff]  ;;  %s649_s25 = smov (!%p266_p3, %s494_s25), 1  ;;  %vm283_vm0 = vcmask 261120   ;;  %vm367_vm1 = vcmask 64512  }
   0xc   : > { %299 = vmatpush.msra.mxu0 %v278_v0  ;;  %v275_v3 = vld [vmem:[%s643_s3] sm:$0xff]  ;;  %s499_s11 = sshll.u32 %s649_s25, 3  ;;  %v310_v12 = vld [vmem:[%s645_s5 + $0x18] sm:$0xff]  ;;  %v309_v13 = vld [vmem:[%s645_s5 + $0x10] sm:$0xff]  ;;  %s500_s8 = sshll.u32 %s649_s25, 2  ;;  %vm439_vm2 = vcmask 257024  }
   0xd   : > { %s269_s14 = scalar_lea.vmem %s642_s2, %s499_s11  ;;  %v517_v5 = vld [vmem:[%s644_s4] ss:$0 sm:$0xff]  ;;  %327 = vmatpush.msra.mxu1 %v310_v12  ;;  %v308_v14 = vld [vmem:[%s645_s5 + $0x8] sm:$0xff]  ;;  %s273_s13 = scalar_lea.vmem %s647_s7, %s500_s8 }
   0xe   : > { %300 = vmatpush.msra.mxu0 %v277_v1  ;;  %v274_v4 = vld [vmem:[%s269_s14] sm:$0xff] }
   0xf   : > { %328 = vmatpush.msra.mxu1 %v309_v13  ;;  %v307_v15 = vld [vmem:[%s645_s5] sm:$0xff] }
  0x10   : > { %301 = vmatpush.msra.mxu0 %v276_v2  ;;  %v518_v26 = vld [vmem:[%s646_s6] ss:$0 sm:$0xff] }
  0x11   : > { %329 = vmatpush.msra.mxu1 %v308_v14  ;;  %v419_v35 = vld [vmem:[%s641_s1] sm:$0xf] }
  0x12   : > { %302 = vmatpush.msra.mxu0 %v275_v3  ;;  %v422_v36 = vperm.slane %v419_v35, 1  ;;  %v420_v39 = vperm.slane %v419_v35, 0  ;;  %v428_v41 = vperm.slane %v419_v35, 2  ;;  %v431_v42 = vperm.slane %v419_v35, 3  ;;  %v437_v50 = vld [vmem:[%s640_s0] sm:$0xf] }
  0x13   : > { %501 = vmatmul.msk.f32.vlgmr.msra.gmra.mxu0 %vm283_vm0, %v274_v4  ;;  %330 = vmatpush.msra.mxu1 %v307_v15 }
  0x14   : > { %502 = vmatmul.msk.f32.vlgmr.msra.gmra.mxu1 %vm283_vm0, %v274_v4 }
  0x90   : > { %v304_v6 = vpop.f32.mrf.mxu0 }
  0x91   : > { %v305_v7 = vadd.f32 %v517_v5, %v304_v6  ;;  %v332_v27 = vpop.f32.mrf.mxu1 }
  0x92   : > { %v333_v28 = vadd.f32 %v518_v26, %v332_v27 }
  0x93   : > { %335 = vxpose.xlu0.b32.start.end [1/1] (short) (narrow) %v305_v7, 16 }
  0x94   : > { %411 = vmatpush.msra.mxu2 %v333_v28  ;;  %507 = vmatpush.msra.mxu3 %v333_v28 }
 0x137   : > { %v351_v8 = vpop.trf.xlu0 }
 0x138   : > { %v368_v9 = vsel %vm367_vm1, %v351_v8, -inf }
 0x139   : > { %369 = vmax.xlane.f32.xlu0 %v368_v9 }
 0x13f   : > { %v352_v10 = vpop.trf.xlu0 }
 0x140   : > { %v371_v11 = vsel %vm367_vm1, %v352_v10, -inf }
 0x141   : > { %372 = vmax.xlane.f32.xlu1 %v371_v11 }
 0x1ac   : > { %v370_v16 = vpop.xlane.xlu0 %369 }
 0x1ad   : > { %v374_v17 = vsub.f32 %v351_v8, %v370_v16 }
 0x1af   : > { %v376_v18 = vmul.f32 1.442695, %v374_v17 }
 0x1b1   : > { %519 = vpow2.f32 %v376_v18 }
 0x1b4   : > { %v373_v19 = vpop.xlane.xlu1 %372 }
 0x1b5   : > { %v375_v20 = vsub.f32 %v352_v10, %v373_v19 }
 0x1b7   : > { %v520_v21 = vpop.eup %519  ;;  %v378_v22 = vmul.f32 1.442695, %v375_v20 }
 0x1b8   : > { %v380_v23 = vsel %vm367_vm1, %v520_v21, 0.0 }
 0x1b9   : > { %521 = vpow2.f32 %v378_v22  ;;  %381 = vadd.xlane.f32.xlu1 %v380_v23 }
 0x1bf   : > { %v522_v24 = vpop.eup %521 }
 0x1c0   : > { %v383_v25 = vsel %vm367_vm1, %v522_v24, 0.0 }
 0x1c1   : > { %384 = vadd.xlane.f32.xlu2 %v383_v25 }
 0x22c   : > { %v382_v29 = vpop.xlane.xlu1 %381 }
 0x22d   : > { %523 = vrcp.f32 %v382_v29 }
 0x233   : > { %v524_v30 = vpop.eup %523 }
 0x234   : > { %v385_v31 = vpop.xlane.xlu2 %384  ;;  %v388_v32 = vmul.f32 %v524_v30, %v520_v21 }
 0x235   : > { %525 = vrcp.f32 %v385_v31 }
 0x236   : > { %503 = vmatmul.msk.f32.vlgmr.msra.gmra.mxu2 %vm367_vm1, %v388_v32 }
 0x23b   : > { %v526_v33 = vpop.eup %525 }
 0x23c   : > { %v389_v34 = vmul.f32 %v526_v33, %v522_v24 }
 0x23e   : > { %504 = vmatmul.msk.f32.vlgmr.msra.gmra.mxu3 %vm367_vm1, %v389_v34 }
 0x2b9   : > { %v413_v37 = vpop.f32.mrf.mxu2 }
 0x2ba   : > { %v423_v38 = vmul.f32 %v422_v36, %v413_v37  ;;  %v421_v43 = vmul.f32 %v420_v39, %v413_v37 }
 0x2bc   : > { %v425_v40 = vrot.slane %v423_v38, 4 }
 0x2be   : > { %v427_v45 = vadd.f32 %v425_v40, %v421_v43 }
 0x2c1   : > { %v416_v44 = vpop.f32.mrf.mxu3 }
 0x2c2   : > { %v429_v46 = vmul.f32 %v428_v41, %v416_v44  ;;  %v432_v47 = vmul.f32 %v431_v42, %v416_v44 }
 0x2c4   : > { %v430_v48 = vadd.f32 %v429_v46, %v427_v45  ;;  %v434_v49 = vrot.slane %v432_v47, 4 }
 0x2c6   : > { %v436_v51 = vadd.f32 %v434_v49, %v430_v48 }
 0x2c8   : > { %v438_v52 = vadd.f32 %v437_v50, %v436_v51 }
 0x2ca   : > { %440 = vst.msk [vmem:[%s273_s13] sm:$0xf] %vm439_vm2, %v438_v52 }
 0x2cb PF: > { %s17_s24 = sadd.s32 1, %s533_s24  }
 0x2cc   : > { %p14_p4 = scmp.ge.s32.totalorder %s17_s24, 4  }
 0x2ce   :  { %16 = sbr.rel (!%p14_p4) target bundleno = 1 (0x1), region = 78 }

</bundles_post_ra>
